<compile_context>
chip_gen: v7x
topology: tpu7x:2x2x1
jax: 0.10.0
libtpu: 0.0.40
codegen_flags: <defaults>
</compile_context>

<pallas_src>
import jax
import jax.numpy as jnp
from jax.experimental import pallas as pl
from jax.experimental.pallas import tpu as pltpu


def _round_up(a: int, m: int) -> int:
    return ((a + m - 1) // m) * m


def _largest_divisor_leq(n: int, cap: int) -> int:
    cap = max(1, min(n, cap))
    for c in range(cap, 0, -1):
        if n % c == 0:
            return c
    return 1


def _make_conv_stack_kernel(num_conv_layers: int, nb: int):
    """Kernel body: repeat (W_block @ x + b, relu) num_conv_layers times on nb (d, Wt) slabs."""

    def kernel(x_ref, w_ref, b_ref, o_ref):
        # x_ref : (nb, d, Wt) activations -- channels on sublanes, positions on lanes
        # w_ref : (d, d)      block-diagonal grouped-conv weight (VMEM-resident)
        # b_ref : (d, 1)      bias column (lane-broadcast is fused into the add)
        w = w_ref[...].astype(jnp.float32)
        b = b_ref[...].astype(jnp.float32)              # (d, 1)
        for i in range(nb):                             # nb is small & static
            x = x_ref[i].astype(jnp.float32)            # (d, Wt)
            for _ in range(num_conv_layers):
                # TODO(synk): train-mode nn.Dropout(p=1-dropout) on even layers is
                # intentionally omitted (eval/inference semantics).
                x = jnp.dot(w, x, preferred_element_type=jnp.float32) + b
                x = jnp.maximum(x, 0.0)                 # ReLU
            o_ref[i] = x.astype(o_ref.dtype)

    return kernel


def convolution_layer_forward(inputs, sublayers, conv_weight, conv_bias,
                              num_conv_layers, *, w_tile=2048,
                              fullw_slab_bytes=2 * 1024 * 1024):
    """
    inputs:      (N, d, W) float32   (PyTorch NCW; H=1 is implicit)
    sublayers:   (l, L) tuple of scalars (passed through, l is returned)
    conv_weight: (d, d//2, 1, 1)     (nn.Conv2d(d, d, 1, groups=2).weight)
    conv_bias:   (d,)
    w_tile:      positions per block on the W-tiled fallback path (multiple of 128)
    fullw_slab_bytes: max bytes for one (nb, d, W) slab on the full-W path
    returns: (outputs (N, d, W), l)
    """
    l, L = sublayers
    N, d, W = inputs.shape
    g = d // 2

    # --- glue: block-diagonal (d, d) weight equivalent to the grouped 1x1 conv ---
    #   out[:g] = W[:g] @ x[:g]   ;   out[g:] = W[g:] @ x[g:]
    w2d = conv_weight[..., 0, 0].astype(jnp.float32)     # (d, d//2)
    w_block = jnp.zeros((d, d), dtype=jnp.float32)
    w_block = w_block.at[:g, :g].set(w2d[:g])
    w_block = w_block.at[g:, g:].set(w2d[g:])
    b_col = conv_bias.astype(jnp.float32).reshape(d, 1)

    bytes_per_row = d * W * inputs.dtype.itemsize

    if bytes_per_row <= fullw_slab_bytes:
        # ---------- full-W path: no padding, no slicing, 1 read + 1 write ----------
        # Block several batch rows per step to amortize the fixed per-step overhead,
        # but keep >=2 grid steps when N >= 2 so a v7x megacore split stays balanced.
        budget_rows = max(1, fullw_slab_bytes // bytes_per_row)
        cap = budget_rows if N < 2 else min(budget_rows, max(1, N // 2))
        nb = _largest_divisor_leq(N, cap)
        outputs = pl.pallas_call(
            _make_conv_stack_kernel(num_conv_layers, nb),
            out_shape=jax.ShapeDtypeStruct((N, d, W), inputs.dtype),
            grid_spec=pltpu.PrefetchScalarGridSpec(
                num_scalar_prefetch=0,
                grid=(N // nb,),
                in_specs=[
                    pl.BlockSpec((nb, d, W), lambda i: (i, 0, 0)),   # activation slab
                    pl.BlockSpec((d, d), lambda i: (0, 0)),          # resident weight
                    pl.BlockSpec((d, 1), lambda i: (0, 0)),          # resident bias
                ],
                out_specs=pl.BlockSpec((nb, d, W), lambda i: (i, 0, 0)),
            ),
            compiler_params=pltpu.CompilerParams(
                dimension_semantics=("parallel",),
            ),
        )(inputs, w_block, b_col)
        return outputs, l

    # ---------- W-tiled fallback (very large W): ragged tail via cdiv grid ----------
    assert w_tile % 128 == 0, "w_tile must be a multiple of 128 (lane width)"
    wt = min(w_tile, _round_up(W, 128))      # lane-dense tile width
    num_w_tiles = pl.cdiv(W, wt)             # ragged last tile handled by Pallas masking
    # Flatten (batch, W-tile) into one 1-D parallel grid so v7x TCs split evenly.
    grid = (N * num_w_tiles,)
    act_map = lambda i: (i // num_w_tiles, 0, i % num_w_tiles)
    outputs = pl.pallas_call(
        _make_conv_stack_kernel(num_conv_layers, 1),
        out_shape=jax.ShapeDtypeStruct((N, d, W), inputs.dtype),
        grid_spec=pltpu.PrefetchScalarGridSpec(
            num_scalar_prefetch=0,
            grid=grid,
            in_specs=[
                pl.BlockSpec((1, d, wt), act_map),                   # activation slab
                pl.BlockSpec((d, d), lambda i: (0, 0)),              # resident weight
                pl.BlockSpec((d, 1), lambda i: (0, 0)),              # resident bias
            ],
            out_specs=pl.BlockSpec((1, d, wt), act_map),
        ),
        compiler_params=pltpu.CompilerParams(
            dimension_semantics=("parallel",),
        ),
    )(inputs, w_block, b_col)
    return outputs, l


def _reference_forward(inputs, sublayers, conv_weight, conv_bias, num_conv_layers):
    """Pure-JAX reference (grouped 1x1 conv + relu, repeated; eval-mode dropout)."""
    l, L = sublayers
    N, d, W = inputs.shape
    g = d // 2
    w2d = conv_weight[..., 0, 0]
    x = jnp.transpose(inputs, (0, 2, 1)).reshape(N * W, d)
    for _ in range(num_conv_layers):
        y0 = x[:, :g] @ jnp.transpose(w2d[:g]) + conv_bias[:g]
        y1 = x[:, g:] @ jnp.transpose(w2d[g:]) + conv_bias[g:]
        x = jnp.maximum(jnp.concatenate([y0, y1], axis=-1), 0.0)
    return jnp.transpose(x.reshape(N, W, d), (0, 2, 1)), l


if __name__ == "__main__":
    # Module config: d is fixed at 128 by the Conv2d(d, d, 1, groups=2) construction.
    num_conv_layers = 2
    d = 128

    key = jax.random.PRNGKey(0)
    k_x, k_w, k_b, k_x2 = jax.random.split(key, 4)

    conv_weight = 0.05 * jax.random.normal(k_w, (d, d // 2, 1, 1), dtype=jnp.float32)
    conv_bias = 0.05 * jax.random.normal(k_b, (d,), dtype=jnp.float32)
    sublayers = (jnp.float32(1.0), jnp.float32(4.0))  # (l, L)

    # --- 1) small-shape config -> full-W path (no pad, no slice, batch-blocked grid) ---
    N, W = 2, 16  # inputs (N, d, W); conv input NCHW is (N, d, 1, W)
    inputs = jax.random.normal(k_x, (N, d, W), dtype=jnp.float32)
    out, l_out = convolution_layer_forward(
        inputs, sublayers, conv_weight, conv_bias, num_conv_layers
    )
    out = jax.block_until_ready(out)
    ref, l_ref = _reference_forward(
        inputs, sublayers, conv_weight, conv_bias, num_conv_layers
    )
    assert out.shape == (N, d, W)
    assert jnp.allclose(out, ref, atol=1e-5, rtol=1e-5)
    assert jnp.allclose(l_out, l_ref)

    # --- 2) ragged-W config forced onto the W-tiled path (cdiv grid, masked tail) ---
    N2, W2 = 2, 200  # 200 is not a multiple of 128 -> exercises the ragged last tile
    inputs2 = jax.random.normal(k_x2, (N2, d, W2), dtype=jnp.float32)
    out2, _ = convolution_layer_forward(
        inputs2, sublayers, conv_weight, conv_bias, num_conv_layers,
        w_tile=128, fullw_slab_bytes=0,   # force the tiled fallback path
    )
    out2 = jax.block_until_ready(out2)
    ref2, _ = _reference_forward(
        inputs2, sublayers, conv_weight, conv_bias, num_conv_layers
    )
    assert out2.shape == (N2, d, W2)
    assert jnp.allclose(out2, ref2, atol=1e-5, rtol=1e-5)

    print("KERNEL_OK")
</pallas_src>

<mosaic_0001>
module attributes {stable_mosaic.version = 11 : i64} {
  func.func @kernel(%arg0: i32, %arg1: memref<1x128x16xf32, #tpu.memory_space<vmem>>, %arg2: memref<128x128xf32, #tpu.memory_space<vmem>>, %arg3: memref<128x1xf32, #tpu.memory_space<vmem>>, %arg4: memref<1x128x16xf32, #tpu.memory_space<vmem>>) attributes {dimension_semantics = [#tpu.dimension_semantics<parallel>], iteration_bounds = array<i64: 2>, scalar_prefetch = 0 : i64, scratch_operands = 0 : i64, tpu.core_type = #tpu.core_type<tc>, window_params = [{transform_indices = @transform_0, window_bounds = array<i64: 1, 128, 16>}, {pipeline_mode = #tpu.pipeline_mode<synchronous>, transform_indices = @transform_1, window_bounds = array<i64: 128, 128>}, {pipeline_mode = #tpu.pipeline_mode<synchronous>, transform_indices = @transform_2, window_bounds = array<i64: 128, 1>}, {transform_indices = @transform_3, window_bounds = array<i64: 1, 128, 16>}]} {
    %c0 = arith.constant 0 : index
    %c0_0 = arith.constant 0 : index
    %0 = vector.load %arg2[%c0, %c0_0] : memref<128x128xf32, #tpu.memory_space<vmem>>, vector<128x128xf32>
    %c0_1 = arith.constant 0 : index
    %c0_2 = arith.constant 0 : index
    %1 = vector.load %arg3[%c0_1, %c0_2] : memref<128x1xf32, #tpu.memory_space<vmem>>, vector<128x1xf32>
    %c0_3 = arith.constant 0 : index
    %c0_4 = arith.constant 0 : index
    %c0_5 = arith.constant 0 : index
    %2 = vector.load %arg1[%c0_3, %c0_4, %c0_5] : memref<1x128x16xf32, #tpu.memory_space<vmem>>, vector<1x128x16xf32>
    %3 = vector.shape_cast %2 : vector<1x128x16xf32> to vector<128x16xf32>
    %cst = arith.constant dense<0.000000e+00> : vector<128x16xf32>
    %4 = tpu.matmul %0, %3, %cst {dimension_numbers = #tpu.dot_dimension_numbers<[1], [0], [0], [1], [0, 0, 1, 1], [], []>} : vector<128x128xf32>, vector<128x16xf32>, vector<128x16xf32> -> vector<128x16xf32>
    %5 = vector.broadcast %1 : vector<128x1xf32> to vector<128x16xf32>
    %6 = arith.addf %4, %5 : vector<128x16xf32>
    %cst_6 = arith.constant 0.000000e+00 : f32
    %7 = vector.broadcast %cst_6 : f32 to vector<128x16xf32>
    %8 = arith.maximumf %6, %7 : vector<128x16xf32>
    %cst_7 = arith.constant dense<0.000000e+00> : vector<128x16xf32>
    %9 = tpu.matmul %0, %8, %cst_7 {dimension_numbers = #tpu.dot_dimension_numbers<[1], [0], [0], [1], [0, 0, 1, 1], [], []>} : vector<128x128xf32>, vector<128x16xf32>, vector<128x16xf32> -> vector<128x16xf32>
    %10 = vector.broadcast %1 : vector<128x1xf32> to vector<128x16xf32>
    %11 = arith.addf %9, %10 : vector<128x16xf32>
    %cst_8 = arith.constant 0.000000e+00 : f32
    %12 = vector.broadcast %cst_8 : f32 to vector<128x16xf32>
    %13 = arith.maximumf %11, %12 : vector<128x16xf32>
    %c0_9 = arith.constant 0 : index
    %c0_10 = arith.constant 0 : index
    %c0_11 = arith.constant 0 : index
    %14 = vector.load %arg4[%c0_9, %c0_10, %c0_11] : memref<1x128x16xf32, #tpu.memory_space<vmem>>, vector<1x128x16xf32>
    %15 = vector.shape_cast %14 : vector<1x128x16xf32> to vector<128x16xf32>
    %16 = vector.shape_cast %13 : vector<128x16xf32> to vector<1x128x16xf32>
    tpu.vector_store %arg4[%c0_9, %c0_10, %c0_11], %16 {strides = array<i32>} : memref<1x128x16xf32, #tpu.memory_space<vmem>>, vector<1x128x16xf32>,
    return
  }
  func.func @transform_0(%arg0: i32) -> (i32, i32, i32) {
    %c0_i32 = arith.constant 0 : i32
    %c0_i32_0 = arith.constant 0 : i32
    %c0_i32_1 = arith.constant 0 : i32
    return %arg0, %c0_i32, %c0_i32_0 : i32, i32, i32
  }
  func.func @transform_1(%arg0: i32) -> (i32, i32) {
    %c0_i32 = arith.constant 0 : i32
    %c0_i32_0 = arith.constant 0 : i32
    %c0_i32_1 = arith.constant 0 : i32
    return %c0_i32, %c0_i32_0 : i32, i32
  }
  func.func @transform_2(%arg0: i32) -> (i32, i32) {
    %c0_i32 = arith.constant 0 : i32
    %c0_i32_0 = arith.constant 0 : i32
    %c0_i32_1 = arith.constant 0 : i32
    return %c0_i32, %c0_i32_0 : i32, i32
  }
  func.func @transform_3(%arg0: i32) -> (i32, i32, i32) {
    %c0_i32 = arith.constant 0 : i32
    %c0_i32_0 = arith.constant 0 : i32
    %c0_i32_1 = arith.constant 0 : i32
    return %arg0, %c0_i32, %c0_i32_0 : i32, i32, i32
  }
}

</mosaic_0001>

<bundles_post_ra>
// kernel: tpu_custom_call.1
= control target key start
LH: loop header
LB: loop body
LE: loop exit
PB: predicated region body
PF: predicated region fallthrough
CT: control target
= control target key end

     0   :  { %s986_s12 = smov 0   ;;  %s1282_s0 = inlined_call_operand.vmem [shape: f32[2,128,16], index: 0, kind: input, shape index: {}]   ;;  %s1283_s1 = inlined_call_operand.vmem [shape: f32[128,128], index: 1, kind: input, shape index: {}]   ;;  %s1284_s2 = inlined_call_operand.vmem [shape: f32[128,1], index: 2, kind: input, shape index: {}]   ;;  %s1285_s3 = inlined_call_operand.vmem [shape: f32[2,128,16], index: 3, kind: output, shape index: {}]  }
   0x1 LB: > { %s693_s13 = sadd.s32 4294967295, %s963_s12   ;;  %p697_p0 = scmp.ge.s32.totalorder %s963_s12, 1  ;;  %s963_s12 = sphi %s986_s12, %s13_s12  }
   0x2   : > { %p137_p1 = scmp.lt.s32.totalorder %s963_s12, 3 }
   0x4   : > { %p138_p2 = pnand %p697_p0, %p137_p1 }
   0x5   : > { %p161_p3 = scmp.lt.s32.totalorder (!%p138_p2), %s693_s13, 1  ;;  %v171_v0 = vld [vmem:[%s1283_s1] sm:$0xff] (!%p138_p2)  ;;  %v965_v1 = vmov (!%p138_p2), 0   ;;  %v189_v3 = vld [vmem:[%s1284_s2 + $0x10] sm:$0xff] (!%p138_p2)  ;;  %v188_v13 = vld [vmem:[%s1284_s2 + $0x8] sm:$0xff] (!%p138_p2)  ;;  %vm621_vm0 = vcmask (!%p138_p2), 130048  }
   0x6   : > { %141 = sbr.rel (%p138_p2) target bundleno = 548 (0x224), region = 32  ;;  %802 = vmatprep.mubr.f32.mxu0 (!%p138_p2), %v171_v0  ;;  %955 = vset.pattern.permute.xlu0 (!%p138_p2), %v965_v1  ;;  %v187_v2 = vld [vmem:[%s1284_s2] sm:$0xff] (!%p138_p2)  ;;  %v190_v14 = vld [vmem:[%s1284_s2 + $0x18] sm:$0xff] (!%p138_p2)  ;;  %v192_v18 = vld [vmem:[%s1284_s2 + $0x28] sm:$0xff] (!%p138_p2) }
   0x7   : > { %956 = vset.pattern.permute.xlu1 (!%p138_p2), %v965_v1  ;;  %858 = vmatprep.mubr.f32.mxu1 (!%p138_p2), %v171_v0  ;;  %v191_v17 = vld [vmem:[%s1284_s2 + $0x20] sm:$0xff] (!%p138_p2)  ;;  %v193_v22 = vld [vmem:[%s1284_s2 + $0x30] sm:$0xff] (!%p138_p2)  ;;  %v194_v23 = vld [vmem:[%s1284_s2 + $0x38] sm:$0xff] (!%p138_p2) }
   0x8   : > { %221 = vperm.xlu0 (!%p138_p2), %955, %v187_v2   ;;  %231 = vperm.xlu1 (!%p138_p2), %956, %v189_v3   ;;  %v195_v27 = vld [vmem:[%s1284_s2 + $0x40] sm:$0xff] (!%p138_p2)  ;;  %v196_v28 = vld [vmem:[%s1284_s2 + $0x48] sm:$0xff] (!%p138_p2)  ;;  %v197_v32 = vld [vmem:[%s1284_s2 + $0x50] sm:$0xff] (!%p138_p2) }
   0x9   : > { %v198_v33 = vld [vmem:[%s1284_s2 + $0x58] sm:$0xff] (!%p138_p2)  ;;  %v199_v37 = vld [vmem:[%s1284_s2 + $0x60] sm:$0xff] (!%p138_p2)  ;;  %v200_v38 = vld [vmem:[%s1284_s2 + $0x68] sm:$0xff] (!%p138_p2) }
   0xa   : > { %v201_v40 = vld [vmem:[%s1284_s2 + $0x70] sm:$0xff] (!%p138_p2)  ;;  %v202_v41 = vld [vmem:[%s1284_s2 + $0x78] sm:$0xff] (!%p138_p2)  ;;  %v1074_v42 = vld [vmem:[%s1283_s1 + $0x8] sm:$0xff] (!%p138_p2) }
   0xb   : > { %v1079_v43 = vld [vmem:[%s1283_s1 + $0x10] sm:$0xff] (!%p138_p2)  ;;  %v1086_v44 = vld [vmem:[%s1283_s1 + $0x18] sm:$0xff] (!%p138_p2)  ;;  %v1091_v45 = vld [vmem:[%s1283_s1 + $0x20] sm:$0xff] (!%p138_p2) }
   0xc   : > { %226 = vperm.xlu0 (!%p138_p2), %955, %v188_v13   ;;  %236 = vperm.xlu1 (!%p138_p2), %956, %v190_v14   ;;  %v1098_v46 = vld [vmem:[%s1283_s1 + $0x28] sm:$0xff] (!%p138_p2)  ;;  %v1103_v47 = vld [vmem:[%s1283_s1 + $0x30] sm:$0xff] (!%p138_p2)  ;;  %v1110_v48 = vld [vmem:[%s1283_s1 + $0x38] sm:$0xff] (!%p138_p2) }
   0xd   : > { %s1287_s13 = smov (!%p161_p3, %s693_s13), 1  ;;  %v1115_v49 = vld [vmem:[%s1283_s1 + $0x40] sm:$0xff]  ;;  %v1122_v50 = vld [vmem:[%s1283_s1 + $0x48] sm:$0xff]  ;;  %v1127_v51 = vld [vmem:[%s1283_s1 + $0x50] sm:$0xff] }
   0xe   : > { %s704_s16 = sshll.u32 %s1287_s13, 7  ;;  %v1134_v52 = vld [vmem:[%s1283_s1 + $0x58] sm:$0xff]  ;;  %v1139_v53 = vld [vmem:[%s1283_s1 + $0x60] sm:$0xff]  ;;  %v1146_v54 = vld [vmem:[%s1283_s1 + $0x68] sm:$0xff] }
   0xf   : > { %s1005_s19 = scalar_lea.vmem %s1282_s0, %s704_s16  ;;  %v1151_v55 = vld [vmem:[%s1283_s1 + $0x70] sm:$0xff]  ;;  %v1158_v56 = vld [vmem:[%s1283_s1 + $0x78] sm:$0xff]  ;;  %s1230_s9 = scalar_lea.vmem %s1285_s3, %s704_s16 }
  0x10   : > { %v203_v4 = vld [vmem:[%s1005_s19] sm:$0xff]  ;;  %v204_v5 = vld [vmem:[%s1005_s19 + $0x8] sm:$0xff]  ;;  %v205_v6 = vld [vmem:[%s1005_s19 + $0x10] sm:$0xff]  ;;  %241 = vperm.xlu0 %955, %v191_v17   ;;  %246 = vperm.xlu1 %956, %v192_v18  }
  0x11   : > { %v882_v7 = vpack.c.bf16 %v204_v5, %v203_v4  ;;  %v206_v8 = vld [vmem:[%s1005_s19 + $0x18] sm:$0xff]  ;;  %v207_v10 = vld [vmem:[%s1005_s19 + $0x20] sm:$0xff]  ;;  %v208_v11 = vld [vmem:[%s1005_s19 + $0x28] sm:$0xff] }
  0x12   : > { %v886_v9 = vpack.c.bf16 %v206_v8, %v205_v6  ;;  %v890_v12 = vpack.c.bf16 %v208_v11, %v207_v10  ;;  %v209_v15 = vld [vmem:[%s1005_s19 + $0x30] sm:$0xff]  ;;  %v210_v16 = vld [vmem:[%s1005_s19 + $0x38] sm:$0xff]  ;;  %v211_v20 = vld [vmem:[%s1005_s19 + $0x40] sm:$0xff] }
  0x13   : > { %883 = vmatprep.subr.bf16.mxu0 %v882_v7  ;;  %v894_v19 = vpack.c.bf16 %v210_v16, %v209_v15  ;;  %v212_v21 = vld [vmem:[%s1005_s19 + $0x48] sm:$0xff]  ;;  %v213_v25 = vld [vmem:[%s1005_s19 + $0x50] sm:$0xff]  ;;  %v214_v26 = vld [vmem:[%s1005_s19 + $0x58] sm:$0xff] }
  0x14   : > { %885 = vmatpush3.bf16.msra.mxu0 %v882_v7  ;;  %v898_v24 = vpack.c.bf16 %v212_v21, %v211_v20  ;;  %251 = vperm.xlu0 %955, %v193_v22   ;;  %v902_v29 = vpack.c.bf16 %v214_v26, %v213_v25  ;;  %v215_v30 = vld [vmem:[%s1005_s19 + $0x60] sm:$0xff]  ;;  %v216_v31 = vld [vmem:[%s1005_s19 + $0x68] sm:$0xff]  ;;  %v217_v35 = vld [vmem:[%s1005_s19 + $0x70] sm:$0xff] }
  0x15   : > { %887 = vmatprep.subr.bf16.mxu0 %v886_v9  ;;  %256 = vperm.xlu1 %956, %v194_v23   ;;  %v906_v34 = vpack.c.bf16 %v216_v31, %v215_v30  ;;  %v218_v36 = vld [vmem:[%s1005_s19 + $0x78] sm:$0xff] }
  0x16   : > { %v910_v39 = vpack.c.bf16 %v218_v36, %v217_v35 }
  0x18   : > { %889 = vmatpush3.bf16.msra.mxu0 %v886_v9  ;;  %261 = vperm.xlu0 %955, %v195_v27  }
  0x19   : > { %891 = vmatprep.subr.bf16.mxu0 %v890_v12  ;;  %266 = vperm.xlu1 %956, %v196_v28  }
  0x1c   : > { %893 = vmatpush3.bf16.msra.mxu0 %v890_v12  ;;  %271 = vperm.xlu0 %955, %v197_v32  }
  0x1d   : > { %895 = vmatprep.subr.bf16.mxu0 %v894_v19  ;;  %276 = vperm.xlu1 %956, %v198_v33  }
  0x20   : > { %897 = vmatpush3.bf16.msra.mxu0 %v894_v19  ;;  %281 = vperm.xlu0 %955, %v199_v37  }
  0x21   : > { %899 = vmatprep.subr.bf16.mxu0 %v898_v24  ;;  %286 = vperm.xlu1 %956, %v200_v38  }
  0x24   : > { %901 = vmatpush3.bf16.msra.mxu0 %v898_v24  ;;  %291 = vperm.xlu0 %955, %v201_v40  }
  0x25   : > { %903 = vmatprep.subr.bf16.mxu0 %v902_v29  ;;  %296 = vperm.xlu1 %956, %v202_v41  }
  0x28   : > { %905 = vmatpush3.bf16.msra.mxu0 %v902_v29 }
  0x29   : > { %907 = vmatprep.subr.bf16.mxu0 %v906_v34 }
  0x2c   : > { %909 = vmatpush3.bf16.msra.mxu0 %v906_v34 }
  0x2d   : > { %911 = vmatprep.subr.bf16.mxu0 %v910_v39 }
  0x30   : > { %913 = vmatpush3.bf16.msra.mxu0 %v910_v39 }
  0x33   : > { %803 = vmatmul.mubr.f32.vlgmr.msra.gmra.mrb[0].mxu0 %v1074_v42 }
  0x34   : > { %805 = vmatprep.mubr.f32.mxu0 %v1079_v43 }
  0x37   : > { %806 = vmatmul.mubr.f32.gmra.mrb[2].mxu0 %v1086_v44 }
  0x38   : > { %808 = vmatprep.mubr.f32.mxu0 %v1091_v45 }
  0x3b   : > { %809 = vmatmul.mubr.f32.gmra.mrb[4].mxu0 %v1098_v46 }
  0x3c   : > { %811 = vmatprep.mubr.f32.mxu0 %v1103_v47 }
  0x3f   : > { %812 = vmatmul.mubr.f32.gmra.mrb[6].mxu0 %v1110_v48 }
  0x40   : > { %814 = vmatprep.mubr.f32.mxu0 %v1115_v49 }
  0x43   : > { %815 = vmatmul.mubr.f32.gmra.mrb[8].mxu0 %v1122_v50 }
  0x44   : > { %817 = vmatprep.mubr.f32.mxu0 %v1127_v51 }
  0x47   : > { %818 = vmatmul.mubr.f32.gmra.mrb[10].mxu0 %v1134_v52 }
  0x48   : > { %820 = vmatprep.mubr.f32.mxu0 %v1139_v53 }
  0x4b   : > { %821 = vmatmul.mubr.f32.gmra.mrb[12].mxu0 %v1146_v54 }
  0x4c   : > { %823 = vmatprep.mubr.f32.mxu0 %v1151_v55 }
  0x4f   : > { %824 = vmatmul.mubr.f32.gmra.mrb[14].mxu0 %v1158_v56 }
  0x87   : > { %v1161_v57 = vpop.permute.xlu1 %231  ;;  %v1163_v58 = vpop.permute.xlu0 %221 }
  0x8b   : > { %v1165_v59 = vpop.permute.xlu1 %236  ;;  %v1167_v60 = vpop.permute.xlu0 %226 }
  0x8f   : > { %v1169_v61 = vpop.permute.xlu1 %246  ;;  %v1171_v62 = vpop.permute.xlu0 %241 }
  0x93   : > { %v1177_v7 = vpop.permute.xlu0 %251 }
  0x94   : > { %v1175_v4 = vpop.permute.xlu1 %256 }
  0x97   : > { %v1185_v20 = vpop.permute.xlu0 %261 }
  0x98   : > { %v1182_v17 = vpop.permute.xlu1 %266 }
  0x9b   : > { %v1191_v32 = vpop.permute.xlu0 %271 }
  0x9c   : > { %v1189_v29 = vpop.permute.xlu1 %276 }
 0x106   : > { %v804_v63 = vpop.f32.mrb[0].mxu0 }
 0x107   : > { %v371_v0 = vadd.f32 %v804_v63, %v1167_v60  ;;  %v365_v1 = vpop.f32.mrb[1].mxu0  ;;  %v1196_v63 = vpop.permute.xlu1 %286 }
 0x108   : > { %v366_v2 = vadd.f32 %v365_v1, %v1163_v58 }
 0x109   : > { %v445_v3 = vmax.f32 %v371_v0, 0.0 }
 0x10a   : > { %v444_v5 = vmax.f32 %v366_v2, 0.0  ;;  %v807_v6 = vpop.f32.mrb[2].mxu0  ;;  %v1199_v2 = vpop.permute.xlu0 %281 }
 0x10b   : > { %v381_v8 = vadd.f32 %v807_v6, %v1165_v59  ;;  %v375_v9 = vpop.f32.mrb[3].mxu0 }
 0x10c   : > { %v376_v10 = vadd.f32 %v375_v9, %v1161_v57  ;;  %v914_v11 = vpack.c.bf16 %v445_v3, %v444_v5 }
 0x10d   : > { %v447_v12 = vmax.f32 %v381_v8, 0.0 }
 0x10e   : > { %v446_v13 = vmax.f32 %v376_v10, 0.0  ;;  %v810_v14 = vpop.f32.mrb[4].mxu0  ;;  %915 = vmatprep.subr.bf16.mxu1 %v914_v11 }
 0x10f   : > { %v391_v15 = vadd.f32 %v810_v14, %v1169_v61  ;;  %v385_v16 = vpop.f32.mrb[5].mxu0  ;;  %917 = vmatpush3.bf16.msra.mxu1 %v914_v11 }
 0x110   : > { %v918_v18 = vpack.c.bf16 %v447_v12, %v446_v13  ;;  %v386_v19 = vadd.f32 %v385_v16, %v1171_v62  ;;  %v1203_v13 = vpop.permute.xlu1 %296  ;;  %v1205_v16 = vpop.permute.xlu0 %291 }
 0x111   : > { %v449_v21 = vmax.f32 %v391_v15, 0.0 }
 0x112   : > { %v448_v22 = vmax.f32 %v386_v19, 0.0  ;;  %v813_v23 = vpop.f32.mrb[6].mxu0  ;;  %919 = vmatprep.subr.bf16.mxu1 %v918_v18 }
 0x113   : > { %v401_v24 = vadd.f32 %v813_v23, %v1175_v4  ;;  %v395_v25 = vpop.f32.mrb[7].mxu0  ;;  %921 = vmatpush3.bf16.msra.mxu1 %v918_v18 }
 0x114   : > { %v922_v26 = vpack.c.bf16 %v449_v21, %v448_v22  ;;  %v396_v27 = vadd.f32 %v395_v25, %v1177_v7 }
 0x115   : > { %v451_v28 = vmax.f32 %v401_v24, 0.0 }
 0x116   : > { %v450_v30 = vmax.f32 %v396_v27, 0.0  ;;  %v816_v31 = vpop.f32.mrb[8].mxu0  ;;  %923 = vmatprep.subr.bf16.mxu1 %v922_v26 }
 0x117   : > { %v411_v33 = vadd.f32 %v816_v31, %v1182_v17  ;;  %v405_v34 = vpop.f32.mrb[9].mxu0  ;;  %925 = vmatpush3.bf16.msra.mxu1 %v922_v26 }
 0x118   : > { %v926_v35 = vpack.c.bf16 %v451_v28, %v450_v30  ;;  %v406_v36 = vadd.f32 %v405_v34, %v1185_v20 }
 0x119   : > { %v453_v37 = vmax.f32 %v411_v33, 0.0 }
 0x11a   : > { %v452_v38 = vmax.f32 %v406_v36, 0.0  ;;  %v819_v39 = vpop.f32.mrb[10].mxu0  ;;  %927 = vmatprep.subr.bf16.mxu1 %v926_v35 }
 0x11b   : > { %v421_v40 = vadd.f32 %v819_v39, %v1189_v29  ;;  %v415_v41 = vpop.f32.mrb[11].mxu0  ;;  %929 = vmatpush3.bf16.msra.mxu1 %v926_v35 }
 0x11c   : > { %v930_v0 = vpack.c.bf16 %v453_v37, %v452_v38  ;;  %v416_v1 = vadd.f32 %v415_v41, %v1191_v32 }
 0x11d   : > { %v455_v3 = vmax.f32 %v421_v40, 0.0 }
 0x11e   : > { %v454_v5 = vmax.f32 %v416_v1, 0.0  ;;  %v822_v6 = vpop.f32.mrb[12].mxu0  ;;  %931 = vmatprep.subr.bf16.mxu1 %v930_v0 }
 0x11f   : > { %v431_v8 = vadd.f32 %v822_v6, %v1196_v63  ;;  %v425_v9 = vpop.f32.mrb[13].mxu0  ;;  %933 = vmatpush3.bf16.msra.mxu1 %v930_v0 }
 0x120   : > { %v934_v10 = vpack.c.bf16 %v455_v3, %v454_v5  ;;  %v426_v11 = vadd.f32 %v425_v9, %v1199_v2 }
 0x121   : > { %v457_v12 = vmax.f32 %v431_v8, 0.0 }
 0x122   : > { %v456_v14 = vmax.f32 %v426_v11, 0.0  ;;  %v825_v15 = vpop.f32.mrb[14].mxu0  ;;  %935 = vmatprep.subr.bf16.mxu1 %v934_v10 }
 0x123   : > { %v441_v18 = vadd.f32 %v825_v15, %v1203_v13  ;;  %v435_v19 = vpop.f32.mrb[15].mxu0  ;;  %937 = vmatpush3.bf16.msra.mxu1 %v934_v10 }
 0x124   : > { %v938_v21 = vpack.c.bf16 %v457_v12, %v456_v14  ;;  %v436_v22 = vadd.f32 %v435_v19, %v1205_v16 }
 0x125   : > { %v459_v23 = vmax.f32 %v441_v18, 0.0 }
 0x126   : > { %v458_v24 = vmax.f32 %v436_v22, 0.0  ;;  %939 = vmatprep.subr.bf16.mxu1 %v938_v21 }
 0x127   : > { %941 = vmatpush3.bf16.msra.mxu1 %v938_v21 }
 0x128   : > { %v942_v25 = vpack.c.bf16 %v459_v23, %v458_v24 }
 0x12a   : > { %943 = vmatprep.subr.bf16.mxu1 %v942_v25 }
 0x12b   : > { %945 = vmatpush3.bf16.msra.mxu1 %v942_v25 }
 0x12e   : > { %859 = vmatmul.mubr.f32.vlgmr.msra.gmra.mrb[0].mxu1 %v1074_v42 }
 0x12f   : > { %861 = vmatprep.mubr.f32.mxu1 %v1079_v43 }
 0x132   : > { %862 = vmatmul.mubr.f32.gmra.mrb[2].mxu1 %v1086_v44 }
 0x133   : > { %864 = vmatprep.mubr.f32.mxu1 %v1091_v45 }
 0x136   : > { %865 = vmatmul.mubr.f32.gmra.mrb[4].mxu1 %v1098_v46 }
 0x137   : > { %867 = vmatprep.mubr.f32.mxu1 %v1103_v47 }
 0x13a   : > { %868 = vmatmul.mubr.f32.gmra.mrb[6].mxu1 %v1110_v48 }
 0x13b   : > { %870 = vmatprep.mubr.f32.mxu1 %v1115_v49 }
 0x13e   : > { %871 = vmatmul.mubr.f32.gmra.mrb[8].mxu1 %v1122_v50 }
 0x13f   : > { %873 = vmatprep.mubr.f32.mxu1 %v1127_v51 }
 0x142   : > { %874 = vmatmul.mubr.f32.gmra.mrb[10].mxu1 %v1134_v52 }
 0x143   : > { %876 = vmatprep.mubr.f32.mxu1 %v1139_v53 }
 0x146   : > { %877 = vmatmul.mubr.f32.gmra.mrb[12].mxu1 %v1146_v54 }
 0x147   : > { %879 = vmatprep.mubr.f32.mxu1 %v1151_v55 }
 0x14a   : > { %880 = vmatmul.mubr.f32.gmra.mrb[14].mxu1 %v1158_v56 }
 0x201   : > { %v860_v42 = vpop.f32.mrb[0].mxu1 }
 0x202   : > { %v532_v43 = vadd.f32 %v860_v42, %v1167_v60  ;;  %v526_v44 = vpop.f32.mrb[1].mxu1 }
 0x203   : > { %v527_v45 = vadd.f32 %v526_v44, %v1163_v58 }
 0x204   : > { %v606_v46 = vmax.f32 %v532_v43, 0.0 }
 0x205   : > { %v605_v47 = vmax.f32 %v527_v45, 0.0  ;;  %v863_v48 = vpop.f32.mrb[2].mxu1 }
 0x206   : > { %623 = vst.msk [vmem:[%s1230_s9 + $0x8] sm:$0xff] %vm621_vm0, %v606_v46  ;;  %v542_v49 = vadd.f32 %v863_v48, %v1165_v59  ;;  %v536_v50 = vpop.f32.mrb[3].mxu1 }
 0x207   : > { %622 = vst.msk [vmem:[%s1230_s9] sm:$0xff] %vm621_vm0, %v605_v47  ;;  %v537_v51 = vadd.f32 %v536_v50, %v1161_v57 }
 0x208   : > { %v608_v52 = vmax.f32 %v542_v49, 0.0 }
 0x209   : > { %v607_v53 = vmax.f32 %v537_v51, 0.0  ;;  %v866_v54 = vpop.f32.mrb[4].mxu1 }
 0x20a   : > { %625 = vst.msk [vmem:[%s1230_s9 + $0x18] sm:$0xff] %vm621_vm0, %v608_v52  ;;  %v552_v55 = vadd.f32 %v866_v54, %v1169_v61  ;;  %v546_v56 = vpop.f32.mrb[5].mxu1 }
 0x20b   : > { %624 = vst.msk [vmem:[%s1230_s9 + $0x10] sm:$0xff] %vm621_vm0, %v607_v53  ;;  %v547_v58 = vadd.f32 %v546_v56, %v1171_v62 }
 0x20c   : > { %v610_v59 = vmax.f32 %v552_v55, 0.0 }
 0x20d   : > { %v609_v60 = vmax.f32 %v547_v58, 0.0  ;;  %v869_v26 = vpop.f32.mrb[6].mxu1 }
 0x20e   : > { %627 = vst.msk [vmem:[%s1230_s9 + $0x28] sm:$0xff] %vm621_vm0, %v610_v59  ;;  %v562_v57 = vadd.f32 %v869_v26, %v1175_v4  ;;  %v556_v27 = vpop.f32.mrb[7].mxu1 }
 0x20f   : > { %626 = vst.msk [vmem:[%s1230_s9 + $0x20] sm:$0xff] %vm621_vm0, %v609_v60  ;;  %v557_v61 = vadd.f32 %v556_v27, %v1177_v7 }
 0x210   : > { %v612_v28 = vmax.f32 %v562_v57, 0.0 }
 0x211   : > { %v611_v30 = vmax.f32 %v557_v61, 0.0  ;;  %v872_v31 = vpop.f32.mrb[8].mxu1 }
 0x212   : > { %629 = vst.msk [vmem:[%s1230_s9 + $0x38] sm:$0xff] %vm621_vm0, %v612_v28  ;;  %v572_v62 = vadd.f32 %v872_v31, %v1182_v17  ;;  %v566_v33 = vpop.f32.mrb[9].mxu1 }
 0x213   : > { %628 = vst.msk [vmem:[%s1230_s9 + $0x30] sm:$0xff] %vm621_vm0, %v611_v30  ;;  %v567_v4 = vadd.f32 %v566_v33, %v1185_v20 }
 0x214   : > { %v614_v34 = vmax.f32 %v572_v62, 0.0 }
 0x215   : > { %v613_v35 = vmax.f32 %v567_v4, 0.0  ;;  %v875_v36 = vpop.f32.mrb[10].mxu1 }
 0x216   : > { %631 = vst.msk [vmem:[%s1230_s9 + $0x48] sm:$0xff] %vm621_vm0, %v614_v34  ;;  %v582_v7 = vadd.f32 %v875_v36, %v1189_v29  ;;  %v576_v37 = vpop.f32.mrb[11].mxu1 }
 0x217   : > { %630 = vst.msk [vmem:[%s1230_s9 + $0x40] sm:$0xff] %vm621_vm0, %v613_v35  ;;  %v577_v17 = vadd.f32 %v576_v37, %v1191_v32 }
 0x218   : > { %v616_v38 = vmax.f32 %v582_v7, 0.0 }
 0x219   : > { %v615_v39 = vmax.f32 %v577_v17, 0.0  ;;  %v878_v40 = vpop.f32.mrb[12].mxu1 }
 0x21a   : > { %633 = vst.msk [vmem:[%s1230_s9 + $0x58] sm:$0xff] %vm621_vm0, %v616_v38  ;;  %v592_v20 = vadd.f32 %v878_v40, %v1196_v63  ;;  %v586_v41 = vpop.f32.mrb[13].mxu1 }
 0x21b   : > { %632 = vst.msk [vmem:[%s1230_s9 + $0x50] sm:$0xff] %vm621_vm0, %v615_v39  ;;  %v587_v29 = vadd.f32 %v586_v41, %v1199_v2 }
 0x21c   : > { %v618_v0 = vmax.f32 %v592_v20, 0.0 }
 0x21d   : > { %v617_v1 = vmax.f32 %v587_v29, 0.0  ;;  %v881_v3 = vpop.f32.mrb[14].mxu1 }
 0x21e   : > { %635 = vst.msk [vmem:[%s1230_s9 + $0x68] sm:$0xff] %vm621_vm0, %v618_v0  ;;  %v602_v32 = vadd.f32 %v881_v3, %v1203_v13  ;;  %v596_v5 = vpop.f32.mrb[15].mxu1 }
 0x21f   : > { %634 = vst.msk [vmem:[%s1230_s9 + $0x60] sm:$0xff] %vm621_vm0, %v617_v1  ;;  %v597_v6 = vadd.f32 %v596_v5, %v1205_v16 }
 0x220   : > { %v620_v8 = vmax.f32 %v602_v32, 0.0 }
 0x221   : > { %v619_v9 = vmax.f32 %v597_v6, 0.0 }
 0x222   : > { %637 = vst.msk [vmem:[%s1230_s9 + $0x78] sm:$0xff] %vm621_vm0, %v620_v8 }
 0x223   : > { %636 = vst.msk [vmem:[%s1230_s9 + $0x70] sm:$0xff] %vm621_vm0, %v619_v9 }
 0x224 PF: > { %s13_s12 = sadd.s32 1, %s963_s12  }
 0x225   : > { %p10_p4 = scmp.ge.s32.totalorder %s13_s12, 4  }
 0x227   :  { %12 = sbr.rel (!%p10_p4) target bundleno = 1 (0x1), region = 62 }

</bundles_post_ra>
